<compile_context>
chip_gen: v5e
topology: v5e:2x2
jax: 0.10.0
libtpu: 0.0.40
codegen_flags: <defaults>
</compile_context>

<pallas_src>
import jax
import jax.numpy as jnp
import numpy as np
from jax.experimental import pallas as pl
from jax.experimental.pallas import tpu as pltpu


_LANE = 128
_SUBLANE = 8
_VMEM_BUDGET = 40 << 20          # working-set budget (fits v7x 64 MiB part)
_VMEM_LIMIT = 48 << 20           # scoped VMEM limit handed to Mosaic


def dict_moe_gate_kernel(x_ref, w1_ref, b1_ref, w2_ref, b2_ref, o_ref):
    """One token tile of relu(x @ W1 + b1) @ W2 + b2.

    x_ref : (tb, H)   token tile (native activation dtype)
    w1_ref: (H, H)    fc1 weight (bf16), computes x @ W1
    b1_ref: (1, H)    fc1 bias (f32)
    w2_ref: (H, Ep)   fc2 weight (bf16), expert axis zero-padded to Ep
    b2_ref: (1, Ep)   fc2 bias (f32), zero-padded
    o_ref : (tb, Ep)  gate logits (lane-dense)
    """
    # fc1: bf16 MXU feed, f32 accumulation; bias + ReLU stay on the f32 VPU.
    x = x_ref[...].astype(jnp.bfloat16)
    h = jnp.dot(x, w1_ref[...], preferred_element_type=jnp.float32)
    h = jnp.maximum(h + b1_ref[...], 0.0)

    # fc2: downcast the activation only at the MXU input, accumulate in f32.
    g = jnp.dot(h.astype(jnp.bfloat16), w2_ref[...],
                preferred_element_type=jnp.float32)
    o_ref[...] = (g + b2_ref[...]).astype(o_ref.dtype)


def _round_up(v, m):
    return ((v + m - 1) // m) * m


def _vmem_estimate(tb, H, Ep, x_bytes, out_bytes, weight_bufs):
    """Rough per-kernel VMEM footprint (bytes) for the tile configuration."""
    x_buf = 2 * tb * H * x_bytes                     # x tile, double-buffered
    w_buf = weight_bufs * (H * H + H * Ep) * 2       # bf16 weights (resident)
    b_buf = weight_bufs * _SUBLANE * (H + Ep) * 4    # f32 biases (sublane pad)
    o_buf = 2 * tb * Ep * out_bytes                  # output tile, double-buf
    tmp = tb * (H + Ep) * 4                          # f32 h / g intermediates
    return x_buf + w_buf + b_buf + o_buf + tmp


def dict_moe_gate_forward(hidden_states, w1, b1, w2, b2, *, block_tokens=512):
    """DictMoEGate.forward for num_hidden_layers == 2.

    hidden_states: [..., H]
    w1: [H, H]  transposed fc1.weight (kernel computes x @ w1)
    b1: [H]
    w2: [H, E]  transposed fc2.weight
    b2: [E]
    returns [..., E] gate logits (no softmax in the reference module).
    """
    # TODO(synk): num_hidden_layers in {0, 1} constructor variants (bare
    # parameter return / no fc1) are trivial and not fused here.
    lead = hidden_states.shape[:-1]
    H = hidden_states.shape[-1]
    E = w2.shape[-1]
    Ep = _round_up(E, _LANE)                         # lane-dense expert axis

    x = hidden_states.reshape(-1, H)
    T = x.shape[0]
    x_bytes = x.dtype.itemsize
    out_dtype = hidden_states.dtype
    out_bytes = jnp.dtype(out_dtype).itemsize

    # One-time weight prep: bf16 MXU feed + zero-pad the expert (lane) axis.
    # (x itself is left in its native dtype to avoid an extra HBM cast pass;
    #  the downcast happens on the VPU inside the kernel, hidden under the MXU.)
    w1b = w1.astype(jnp.bfloat16)
    w2b = jnp.pad(w2, ((0, 0), (0, Ep - E))).astype(jnp.bfloat16)
    b1r = b1.reshape(1, H).astype(jnp.float32)
    b2r = jnp.pad(b2.reshape(1, E), ((0, 0), (0, Ep - E))).astype(jnp.float32)

    # ---- token tile size -----------------------------------------------------
    tb = _round_up(min(block_tokens, max(T, 1)), _SUBLANE)
    # v7x megacore: keep >= 2 grid steps so both TensorCores get work.
    if T > _SUBLANE and pl.cdiv(T, tb) < 2:
        tb = _round_up(pl.cdiv(T, 2), _SUBLANE)
    # v7x has 64 MiB VMEM (32 MiB scoped default): shrink tb until we fit.
    while tb > _SUBLANE and _vmem_estimate(tb, H, Ep, x_bytes, out_bytes, 1) > _VMEM_BUDGET:
        tb = max(_SUBLANE, _round_up(tb // 2, _SUBLANE))
    # TODO(synk): for very large H (bf16 W1 alone exceeding the VMEM budget)
    # add a K-reduction grid axis over H with an f32 accumulator scratch
    # instead of shrinking tb.

    grid = (pl.cdiv(T, tb),)

    def _run(single_buffer_weights):
        if single_buffer_weights:
            const = lambda shape: pl.BlockSpec(
                shape, lambda i: (0, 0), pipeline_mode=pl.Buffered(1))
        else:
            const = lambda shape: pl.BlockSpec(shape, lambda i: (0, 0))
        return pl.pallas_call(
            dict_moe_gate_kernel,
            out_shape=jax.ShapeDtypeStruct((T, Ep), out_dtype),
            grid_spec=pltpu.PrefetchScalarGridSpec(
                num_scalar_prefetch=0,
                grid=grid,
                in_specs=[
                    pl.BlockSpec((tb, H), lambda i: (i, 0)),   # x token tile
                    const((H, H)),                             # W1 (resident)
                    const((1, H)),                             # b1
                    const((H, Ep)),                            # W2 (resident)
                    const((1, Ep)),                            # b2
                ],
                out_specs=pl.BlockSpec((tb, Ep), lambda i: (i, 0)),
            ),
            compiler_params=pltpu.CompilerParams(
                # Token axis is embarrassingly parallel -> megacore sharding.
                dimension_semantics=("parallel",),
                vmem_limit_bytes=_VMEM_LIMIT,
            ),
        )(x, w1b, b1r, w2b, b2r)

    try:
        out = _run(True)
    except Exception:
        # pipeline_mode=pl.Buffered(1) unsupported on this jax version ->
        # fall back to default (double-buffered) weight specs.
        out = _run(False)

    return out[:, :E].reshape(*lead, E)


if __name__ == "__main__":
    # Small shapes consistent with DictMoEGate: batch=2, seq=8, hidden=128,
    # num_experts=8 (hidden kept at 128 so the feature lane axis is dense).
    B, S, H, E = 2, 8, 128, 8
    init_lambda = 0.1

    key = jax.random.PRNGKey(0)
    kx, kw1, kw2 = jax.random.split(key, 3)

    hidden_states = jax.random.normal(kx, (B, S, H), dtype=jnp.float32)

    # Mimic the PyTorch init: fc1.weight ~ N(0, 0.01), fc1.bias = 0,
    # fc2.weight ~ N(0, 0.01), fc2.bias = init_lambda.  Weights are stored
    # pre-transposed so the kernel computes x @ W directly.
    w1 = 0.01 * jax.random.normal(kw1, (H, H), dtype=jnp.float32)
    b1 = jnp.zeros((H,), dtype=jnp.float32)
    w2 = 0.01 * jax.random.normal(kw2, (H, E), dtype=jnp.float32)
    b2 = jnp.full((E,), init_lambda, dtype=jnp.float32)

    out = dict_moe_gate_forward(hidden_states, w1, b1, w2, b2)
    out = jax.block_until_ready(out)

    # Reference matched to the kernel's precision (bf16 MXU feed, f32 acc).
    x2d = hidden_states.reshape(-1, H)
    h_ref = jnp.maximum(
        jnp.dot(x2d.astype(jnp.bfloat16), w1.astype(jnp.bfloat16),
                preferred_element_type=jnp.float32) + b1, 0.0)
    ref = (jnp.dot(h_ref.astype(jnp.bfloat16), w2.astype(jnp.bfloat16),
                   preferred_element_type=jnp.float32) + b2).reshape(B, S, E)
    np.testing.assert_allclose(np.asarray(out), np.asarray(ref),
                               rtol=1e-2, atol=1e-4)

    # Looser sanity check vs. the full-f32 PyTorch semantics
    #   gate = relu(x @ W1 + b1) @ W2 + b2   (bf16 weight rounding only).
    ref_f32 = (jnp.maximum(x2d @ w1 + b1, 0.0) @ w2 + b2).reshape(B, S, E)
    np.testing.assert_allclose(np.asarray(out), np.asarray(ref_f32),
                               rtol=5e-2, atol=5e-3)

    print("KERNEL_OK")
</pallas_src>

<mosaic_0001>
module attributes {stable_mosaic.version = 11 : i64} {
  func.func @dict_moe_gate_kernel(%arg0: i32, %arg1: memref<8x128xf32, #tpu.memory_space<vmem>>, %arg2: memref<128x128xbf16, #tpu.memory_space<vmem>>, %arg3: memref<1x128xf32, #tpu.memory_space<vmem>>, %arg4: memref<128x128xbf16, #tpu.memory_space<vmem>>, %arg5: memref<1x128xf32, #tpu.memory_space<vmem>>, %arg6: memref<8x128xf32, #tpu.memory_space<vmem>>) attributes {dimension_semantics = [#tpu.dimension_semantics<parallel>], iteration_bounds = array<i64: 2>, scalar_prefetch = 0 : i64, scratch_operands = 0 : i64, tpu.core_type = #tpu.core_type<tc>, window_params = [{transform_indices = @transform_0, window_bounds = array<i64: 8, 128>}, {pipeline_mode = #tpu.pipeline_mode<synchronous>, transform_indices = @transform_1, window_bounds = array<i64: 128, 128>}, {pipeline_mode = #tpu.pipeline_mode<synchronous>, transform_indices = @transform_2, window_bounds = array<i64: 1, 128>}, {pipeline_mode = #tpu.pipeline_mode<synchronous>, transform_indices = @transform_3, window_bounds = array<i64: 128, 128>}, {pipeline_mode = #tpu.pipeline_mode<synchronous>, transform_indices = @transform_4, window_bounds = array<i64: 1, 128>}, {transform_indices = @transform_5, window_bounds = array<i64: 8, 128>}]} {
    %c0 = arith.constant 0 : index
    %c0_0 = arith.constant 0 : index
    %0 = vector.load %arg1[%c0, %c0_0] : memref<8x128xf32, #tpu.memory_space<vmem>>, vector<8x128xf32>
    %1 = arith.truncf %0 : vector<8x128xf32> to vector<8x128xbf16>
    %c0_1 = arith.constant 0 : index
    %c0_2 = arith.constant 0 : index
    %2 = vector.load %arg2[%c0_1, %c0_2] : memref<128x128xbf16, #tpu.memory_space<vmem>>, vector<128x128xbf16>
    %cst = arith.constant dense<0.000000e+00> : vector<8x128xf32>
    %3 = tpu.matmul %1, %2, %cst {dimension_numbers = #tpu.dot_dimension_numbers<[1], [0], [0], [1], [0, 0, 1, 1], [], []>} : vector<8x128xbf16>, vector<128x128xbf16>, vector<8x128xf32> -> vector<8x128xf32>
    %c0_3 = arith.constant 0 : index
    %c0_4 = arith.constant 0 : index
    %4 = vector.load %arg3[%c0_3, %c0_4] : memref<1x128xf32, #tpu.memory_space<vmem>>, vector<1x128xf32>
    %5 = vector.broadcast %4 : vector<1x128xf32> to vector<8x128xf32>
    %6 = arith.addf %3, %5 : vector<8x128xf32>
    %cst_5 = arith.constant 0.000000e+00 : f32
    %7 = vector.broadcast %cst_5 : f32 to vector<8x128xf32>
    %8 = arith.maximumf %6, %7 : vector<8x128xf32>
    %9 = arith.truncf %8 : vector<8x128xf32> to vector<8x128xbf16>
    %c0_6 = arith.constant 0 : index
    %c0_7 = arith.constant 0 : index
    %10 = vector.load %arg4[%c0_6, %c0_7] : memref<128x128xbf16, #tpu.memory_space<vmem>>, vector<128x128xbf16>
    %cst_8 = arith.constant dense<0.000000e+00> : vector<8x128xf32>
    %11 = tpu.matmul %9, %10, %cst_8 {dimension_numbers = #tpu.dot_dimension_numbers<[1], [0], [0], [1], [0, 0, 1, 1], [], []>} : vector<8x128xbf16>, vector<128x128xbf16>, vector<8x128xf32> -> vector<8x128xf32>
    %c0_9 = arith.constant 0 : index
    %c0_10 = arith.constant 0 : index
    %12 = vector.load %arg5[%c0_9, %c0_10] : memref<1x128xf32, #tpu.memory_space<vmem>>, vector<1x128xf32>
    %13 = vector.broadcast %12 : vector<1x128xf32> to vector<8x128xf32>
    %14 = arith.addf %11, %13 : vector<8x128xf32>
    %c0_11 = arith.constant 0 : index
    %c0_12 = arith.constant 0 : index
    %15 = vector.load %arg6[%c0_11, %c0_12] : memref<8x128xf32, #tpu.memory_space<vmem>>, vector<8x128xf32>
    tpu.vector_store %arg6[%c0_11, %c0_12], %14 {strides = array<i32>} : memref<8x128xf32, #tpu.memory_space<vmem>>, vector<8x128xf32>,
    return
  }
  func.func @transform_0(%arg0: i32) -> (i32, i32) {
    %c0_i32 = arith.constant 0 : i32
    %c0_i32_0 = arith.constant 0 : i32
    return %arg0, %c0_i32 : i32, i32
  }
  func.func @transform_1(%arg0: i32) -> (i32, i32) {
    %c0_i32 = arith.constant 0 : i32
    %c0_i32_0 = arith.constant 0 : i32
    %c0_i32_1 = arith.constant 0 : i32
    return %c0_i32, %c0_i32_0 : i32, i32
  }
  func.func @transform_2(%arg0: i32) -> (i32, i32) {
    %c0_i32 = arith.constant 0 : i32
    %c0_i32_0 = arith.constant 0 : i32
    %c0_i32_1 = arith.constant 0 : i32
    return %c0_i32, %c0_i32_0 : i32, i32
  }
  func.func @transform_3(%arg0: i32) -> (i32, i32) {
    %c0_i32 = arith.constant 0 : i32
    %c0_i32_0 = arith.constant 0 : i32
    %c0_i32_1 = arith.constant 0 : i32
    return %c0_i32, %c0_i32_0 : i32, i32
  }
  func.func @transform_4(%arg0: i32) -> (i32, i32) {
    %c0_i32 = arith.constant 0 : i32
    %c0_i32_0 = arith.constant 0 : i32
    %c0_i32_1 = arith.constant 0 : i32
    return %c0_i32, %c0_i32_0 : i32, i32
  }
  func.func @transform_5(%arg0: i32) -> (i32, i32) {
    %c0_i32 = arith.constant 0 : i32
    %c0_i32_0 = arith.constant 0 : i32
    return %arg0, %c0_i32 : i32, i32
  }
}

module attributes {stable_mosaic.version = 11 : i64} {
  func.func @dict_moe_gate_kernel(%arg0: i32, %arg1: memref<8x128xf32, #tpu.memory_space<vmem>>, %arg2: memref<128x128xbf16, #tpu.memory_space<vmem>>, %arg3: memref<1x128xf32, #tpu.memory_space<vmem>>, %arg4: memref<128x128xbf16, #tpu.memory_space<vmem>>, %arg5: memref<1x128xf32, #tpu.memory_space<vmem>>, %arg6: memref<8x128xf32, #tpu.memory_space<vmem>>) attributes {dimension_semantics = [#tpu.dimension_semantics<parallel>], iteration_bounds = array<i64: 2>, scalar_prefetch = 0 : i64, scratch_operands = 0 : i64, tpu.core_type = #tpu.core_type<tc>, window_params = [{transform_indices = @transform_0, window_bounds = array<i64: 8, 128>}, {pipeline_mode = #tpu.pipeline_mode<synchronous>, transform_indices = @transform_1, window_bounds = array<i64: 128, 128>}, {pipeline_mode = #tpu.pipeline_mode<synchronous>, transform_indices = @transform_2, window_bounds = array<i64: 1, 128>}, {pipeline_mode = #tpu.pipeline_mode<synchronous>, transform_indices = @transform_3, window_bounds = array<i64: 128, 128>}, {pipeline_mode = #tpu.pipeline_mode<synchronous>, transform_indices = @transform_4, window_bounds = array<i64: 1, 128>}, {transform_indices = @transform_5, window_bounds = array<i64: 8, 128>}]} {
    %c0 = arith.constant 0 : index
    %c0_0 = arith.constant 0 : index
    %0 = vector.load %arg1[%c0, %c0_0] : memref<8x128xf32, #tpu.memory_space<vmem>>, vector<8x128xf32>
    %1 = arith.truncf %0 : vector<8x128xf32> to vector<8x128xbf16>
    %c0_1 = arith.constant 0 : index
    %c0_2 = arith.constant 0 : index
    %2 = vector.load %arg2[%c0_1, %c0_2] : memref<128x128xbf16, #tpu.memory_space<vmem>>, vector<128x128xbf16>
    %cst = arith.constant dense<0.000000e+00> : vector<8x128xf32>
    %3 = tpu.matmul %1, %2, %cst {dimension_numbers = #tpu.dot_dimension_numbers<[1], [0], [0], [1], [0, 0, 1, 1], [], []>} : vector<8x128xbf16>, vector<128x128xbf16>, vector<8x128xf32> -> vector<8x128xf32>
    %c0_3 = arith.constant 0 : index
    %c0_4 = arith.constant 0 : index
    %4 = vector.load %arg3[%c0_3, %c0_4] : memref<1x128xf32, #tpu.memory_space<vmem>>, vector<1x128xf32>
    %5 = vector.broadcast %4 : vector<1x128xf32> to vector<8x128xf32>
    %6 = arith.addf %3, %5 : vector<8x128xf32>
    %cst_5 = arith.constant 0.000000e+00 : f32
    %7 = vector.broadcast %cst_5 : f32 to vector<8x128xf32>
    %8 = arith.maximumf %6, %7 : vector<8x128xf32>
    %9 = arith.truncf %8 : vector<8x128xf32> to vector<8x128xbf16>
    %c0_6 = arith.constant 0 : index
    %c0_7 = arith.constant 0 : index
    %10 = vector.load %arg4[%c0_6, %c0_7] : memref<128x128xbf16, #tpu.memory_space<vmem>>, vector<128x128xbf16>
    %cst_8 = arith.constant dense<0.000000e+00> : vector<8x128xf32>
    %11 = tpu.matmul %9, %10, %cst_8 {dimension_numbers = #tpu.dot_dimension_numbers<[1], [0], [0], [1], [0, 0, 1, 1], [], []>} : vector<8x128xbf16>, vector<128x128xbf16>, vector<8x128xf32> -> vector<8x128xf32>
    %c0_9 = arith.constant 0 : index
    %c0_10 = arith.constant 0 : index
    %12 = vector.load %arg5[%c0_9, %c0_10] : memref<1x128xf32, #tpu.memory_space<vmem>>, vector<1x128xf32>
    %13 = vector.broadcast %12 : vector<1x128xf32> to vector<8x128xf32>
    %14 = arith.addf %11, %13 : vector<8x128xf32>
    %c0_11 = arith.constant 0 : index
    %c0_12 = arith.constant 0 : index
    %15 = vector.load %arg6[%c0_11, %c0_12] : memref<8x128xf32, #tpu.memory_space<vmem>>, vector<8x128xf32>
    tpu.vector_store %arg6[%c0_11, %c0_12], %14 {strides = array<i32>} : memref<8x128xf32, #tpu.memory_space<vmem>>, vector<8x128xf32>,
    return
  }
  func.func @transform_0(%arg0: i32) -> (i32, i32) {
    %c0_i32 = arith.constant 0 : i32
    %c0_i32_0 = arith.constant 0 : i32
    return %arg0, %c0_i32 : i32, i32
  }
  func.func @transform_1(%arg0: i32) -> (i32, i32) {
    %c0_i32 = arith.constant 0 : i32
    %c0_i32_0 = arith.constant 0 : i32
    %c0_i32_1 = arith.constant 0 : i32
    return %c0_i32, %c0_i32_0 : i32, i32
  }
  func.func @transform_2(%arg0: i32) -> (i32, i32) {
    %c0_i32 = arith.constant 0 : i32
    %c0_i32_0 = arith.constant 0 : i32
    %c0_i32_1 = arith.constant 0 : i32
    return %c0_i32, %c0_i32_0 : i32, i32
  }
  func.func @transform_3(%arg0: i32) -> (i32, i32) {
    %c0_i32 = arith.constant 0 : i32
    %c0_i32_0 = arith.constant 0 : i32
    %c0_i32_1 = arith.constant 0 : i32
    return %c0_i32, %c0_i32_0 : i32, i32
  }
  func.func @transform_4(%arg0: i32) -> (i32, i32) {
    %c0_i32 = arith.constant 0 : i32
    %c0_i32_0 = arith.constant 0 : i32
    %c0_i32_1 = arith.constant 0 : i32
    return %c0_i32, %c0_i32_0 : i32, i32
  }
  func.func @transform_5(%arg0: i32) -> (i32, i32) {
    %c0_i32 = arith.constant 0 : i32
    %c0_i32_0 = arith.constant 0 : i32
    return %arg0, %c0_i32 : i32, i32
  }
}

</mosaic_0001>

<bundles_post_ra>
// kernel: tpu_custom_call.1
= control target key start
LH: loop header
LB: loop body
LE: loop exit
PB: predicated region body
PF: predicated region fallthrough
CT: control target
= control target key end

     0   :  { %10 = vsyncpa [#allocation3], 0  ;;  %s1068_s0 = inlined_call_operand.hbm [shape: f32[16,128], index: 0, kind: input, shape index: {}]   ;;  %s1069_s1 = inlined_call_operand.hbm [shape: bf16[128,128], index: 1, kind: input, shape index: {}]   ;;  %s1070_s2 = inlined_call_operand.vmem [shape: f32[1,128], index: 2, kind: input, shape index: {}]   ;;  %s1071_s3 = inlined_call_operand.hbm [shape: bf16[128,128], index: 3, kind: input, shape index: {}]   ;;  %s1072_s4 = inlined_call_operand.vmem [shape: f32[1,128], index: 4, kind: input, shape index: {}]   ;;  %s1073_s5 = inlined_call_operand.hbm [shape: f32[16,128], index: 5, kind: output, shape index: {}]  }
   0x1   :  { %12 = vsyncpa [#allocation3 + $0x1], 0 }
   0x2   :  { %13 = vsyncpa [#allocation6], 0 }
   0x3   :  { %14 = vsyncpa [#allocation4], 0 }
   0x4   :  { %16 = vsyncpa [#allocation4 + $0x1], 0  ;;  %s910_s18 = smov 0   ;;  %s912_s19 = smov 0  }
   0x5   :  { %s914_s20 = smov 0   ;;  %s916_s21 = smov 0  }
   0x6 LB: > { %s174_s24 = sshll.u32 %s1069_s1, 4  ;;  %s934_s25 = sadd.s32 4294967295, %s874_s21   ;;  %s874_s21 = sphi %s916_s21, %s1084_s21   ;;  %s870_s20 = sphi %s914_s20, %s1083_s20   ;;  %s866_s19 = sphi %s912_s19, %s1082_s19   ;;  %s862_s18 = sphi %s910_s18, %s1081_s18   ;;  %s175_s24 = int_to_ptr.hbm [resolvable:$true] %s174_s24 }
   0x7   : > { %p548_p0 = scmp.ge.s32.totalorder %s874_s21, 1  ;;  %p43_p1 = scmp.eq.s32.totalorder %s934_s25, 0 }
   0x8   : > { %p163_p2 = scmp.lt.s32.totalorder %s874_s21, 3  ;;  %s876_s27 = smov [#allocation5]  }
   0x9   : > { %s176_s28 = sshll.u32 %s876_s27, 4  ;;  %s191_s6 = sshll.u32 %s1071_s3, 4  ;;  %s177_s28 = int_to_ptr.vmem [resolvable:$true] %s176_s28  ;;  %s192_s6 = int_to_ptr.hbm [resolvable:$true] %s191_s6 }
   0xa   : > { %p939_p3 = pnand %p548_p0, %p163_p2  ;;  %s877_s7 = smov [#allocation7]  }
   0xb   : > { %s193_s8 = sshll.u32 %s877_s7, 4  ;;  %s878_s9 = smov 64   ;;  %s194_s8 = int_to_ptr.vmem [resolvable:$true] %s193_s8 }
   0xc   : > { %p655_p4 = pneg %p939_p3  ;;  %s879_s10 = smov 4  }
   0xd   : > { %s547_s11 = sadd.s32 4294967294, %s874_s21   ;;  %s953_s12 = sadd.s32 1, %s874_s21  }
   0xe   : > { %p656_p6 = pnand %p655_p4, %p43_p1  ;;  %s26_s13 = ssub.s32 %s874_s21, %s953_s12 }
   0xf   : > { %s29_s14 = sadd.s32 1, %s870_s20  ;;  %p27_p7 = scmp.eq.s32.totalorder %s26_s13, 0 }
  0x10   : > { %658 = dma.hbm_to_vmem [thread:$0]  (!%p656_p6), %s175_s24, 1024, %s177_s28, [#allocation6], %s878_s9, %s878_s9, %s879_s10  }
  0x11   : > { %661 = dma.hbm_to_vmem [thread:$0]  (!%p656_p6), %s192_s6, 1024, %s194_s8, [#allocation6], %s878_s9, %s878_s9, %s879_s10  }
  0x12   : > { %p36_p8 = scmp.ne.s32.totalorder %s870_s20, %s866_s19  ;;  %p37_p9 = scmp.eq.s32.totalorder %s874_s21, 0 }
  0x13   : > { %p42_p10 = scmp.ne.s32.totalorder %s866_s19, %s862_s18  ;;  %p150_p13 = scmp.eq.s32.totalorder %s934_s25, 1 }
  0x14   : > { %s964_s15 = scalar_select %p27_p7, %s870_s20, %s29_s14  }
  0x15   : > { %p966_p11 = por %p37_p9, %p36_p8  ;;  %p972_p12 = por %p43_p1, %p42_p10 }
  0x16   : > { %p156_p0 = scmp.eq.s32.totalorder %s547_s11, 1  ;;  %p672_p2 = scmp.lt.s32.totalorder %s874_s21, 2 }
  0x17   : > { %s210_s22 = sand.u32 1, %s870_s20   ;;  %p979_p4 = por %p150_p13, %p36_p8 }
  0x18   : > { %p983_p6 = por %p156_p0, %p42_p10  ;;  %s552_s27 = sshll.u32 %s210_s22, 3 }
  0x19   : > { %s553_s28 = sshll.u32 %s874_s21, 3  ;;  %s214_s7 = scalar_lea.vmem [#allocation2], %s552_s27 }
  0x1a   : > { %s218_s6 = scalar_lea.hbm %s1068_s0, %s553_s28  ;;  %s222_s8 = sshll.u32 %s214_s7, 4  ;;  %s223_s8 = int_to_ptr.vmem [resolvable:$true] %s222_s8 }
  0x1b   : > { %s220_s9 = sshll.u32 %s218_s6, 4  ;;  %p993_p7 = pnand %p672_p2, %p966_p11  ;;  %s221_s9 = int_to_ptr.hbm [resolvable:$true] %s220_s9 }
  0x1c   : > { %s211_s11 = scalar_lea.sflag [#allocation3], %s210_s22  ;;  %s774_s13 = sshra.s32 %s221_s9, 4  ;;  %s775_s13 = int_to_ptr.hbm [resolvable:$true] %s774_s13 }
  0x1d   : > { %s776_s14 = scalar_lea.hbm %s775_s13, 8  ;;  %p778_p9 = pneg %p993_p7 }
  0x1e   : > { %p777_p8 = scmp.ne.s32.totalorder %s775_s13, %s776_s14  ;;  %s781_s29 = scalar_lea.hbm %s1068_s0, 16 }
  0x1f   : > { %p782_p11 = scmp.lt.s32.totalorder %s775_s13, %s1068_s0  ;;  %p783_p0 = scmp.lt.s32.totalorder %s781_s29, %s776_s14 }
  0x20   : > { %p779_p10 = pnand %p778_p9, %p777_p8 }
  0x21   : > { %p784_p2 = por %p783_p0, %p782_p11 }
  0x22   : > { %p780_p13 = pneg %p779_p10 }
  0x24   : > { %p785_p5 = pnand %p784_p2, %p780_p13 }
  0x26   : > { %788 = shalt.err (!%p785_p5)
}
  0x27   : > { %665 = dma.hbm_to_vmem [thread:$0]  (!%p993_p7), %s221_s9, 128, %s223_s8, %s211_s11  }
  0x28   : > { %231 = sbr.rel (%p939_p3) target bundleno = 346 (0x15a), region = 40  ;;  %s1010_s22 = sand.u32 (!%p939_p3), 1, %s866_s19  }
  0x29   : > { %s555_s6 = sshll.u32 (!%p939_p3), %s1010_s22, 3  ;;  %s234_s7 = scalar_lea.sflag (!%p939_p3), [#allocation3], %s1010_s22 }
  0x2a   : > { %s1016_s13 = scalar_lea.vmem (!%p939_p3), [#allocation2], %s555_s6 }
  0x2d   : > { %849 = dma.done.wait (%p972_p12), %s234_s7, 128  }
  0x2e   : > { %851 = vsyncadd (%p972_p12), %s234_s7, 4294967168 }
  0x2f   : > { %853 = dma.done.wait (%p43_p1), [#allocation6], 2048  }
  0x30   : > { %855 = vsyncadd (%p43_p1), [#allocation6], 4294965248  ;;  %v634_v0 = vld [vmem:[#allocation5 + $0x38] sm:$0xff]  ;;  %v633_v1 = vld [vmem:[#allocation5 + $0x30] sm:$0xff]  ;;  %s624_s8 = sshll.u32 %s934_s25, 3  ;;  %s274_s28 = scalar_lea.vmem [#allocation8], %s555_s6 }
  0x31   : > { %345 = vmatpush.bf16.msra.mxu0 %v634_v0  ;;  %v642_v2 = vld [vmem:[#allocation7 + $0x38] sm:$0xff]  ;;  %v641_v3 = vld [vmem:[#allocation7 + $0x30] sm:$0xff]  ;;  %v632_v4 = vld [vmem:[#allocation5 + $0x28] sm:$0xff]  ;;  %s453_s11 = scalar_lea.hbm %s1073_s5, %s624_s8  ;;  %s455_s29 = sshll.u32 %s274_s28, 4  ;;  %s456_s29 = int_to_ptr.vmem [resolvable:$true] %s455_s29 }
  0x32   : > { %428 = vmatpush.bf16.msra.mxu1 %v642_v2  ;;  %v640_v5 = vld [vmem:[#allocation7 + $0x28] sm:$0xff]  ;;  %v631_v6 = vld [vmem:[#allocation5 + $0x20] sm:$0xff]  ;;  %v630_v8 = vld [vmem:[#allocation5 + $0x18] sm:$0xff]  ;;  %s457_s30 = sshll.u32 %s453_s11, 4  ;;  %s443_s16 = scalar_lea.sflag [#allocation4], %s1010_s22  ;;  %s458_s30 = int_to_ptr.hbm [resolvable:$true] %s457_s30 }
  0x33   : > { %v639_v7 = vld [vmem:[#allocation7 + $0x20] sm:$0xff]  ;;  %v638_v9 = vld [vmem:[#allocation7 + $0x18] sm:$0xff]  ;;  %v629_v10 = vld [vmem:[#allocation5 + $0x10] sm:$0xff]  ;;  %s818_s25 = sshra.s32 %s458_s30, 4  ;;  %s824_s17 = scalar_lea.hbm %s1073_s5, 16  ;;  %s819_s25 = int_to_ptr.hbm [resolvable:$true] %s818_s25 }
  0x34   : > { %v637_v11 = vld [vmem:[#allocation7 + $0x10] sm:$0xff]  ;;  %v628_v12 = vld [vmem:[#allocation5 + $0x8] sm:$0xff]  ;;  %v627_v13 = vld [vmem:[#allocation5] sm:$0xff]  ;;  %s820_s7 = scalar_lea.hbm %s819_s25, 8  ;;  %p825_p12 = scmp.lt.s32.totalorder %s819_s25, %s1073_s5 }
  0x35   : > { %346 = vmatpush.bf16.msra.mxu0 %v633_v1  ;;  %v275_v14 = vld [vmem:[%s1016_s13] sm:$0xff]  ;;  %v636_v16 = vld [vmem:[#allocation7 + $0x8] sm:$0xff]  ;;  %v635_v17 = vld [vmem:[#allocation7] sm:$0xff]  ;;  %p821_p1 = scmp.ne.s32.totalorder %s819_s25, %s820_s7  ;;  %p826_p7 = scmp.lt.s32.totalorder %s824_s17, %s820_s7 }
  0x36   : > { %429 = vmatpush.bf16.msra.mxu1 %v641_v3  ;;  %v276_v15 = vpack.c.bf16 %v275_v14, %v275_v14  ;;  %v712_v18 = vld [vmem:[%s1070_s2] ss:$0 sm:$0xff] }
  0x37   : > { %v713_v24 = vld [vmem:[%s1072_s4] ss:$0 sm:$0xff]  ;;  %p822_p3 = pnand %p821_p1, %p979_p4  ;;  %p827_p8 = por %p826_p7, %p825_p12 }
  0x39   : > { %347 = vmatpush.bf16.msra.mxu0 %v632_v4  ;;  %p823_p5 = pneg %p822_p3 }
  0x3a   : > { %430 = vmatpush.bf16.msra.mxu1 %v640_v5 }
  0x3b   : > { %p828_p9 = pnand %p827_p8, %p823_p5 }
  0x3d   : > { %348 = vmatpush.bf16.msra.mxu0 %v631_v6 }
  0x3e   : > { %431 = vmatpush.bf16.msra.mxu1 %v639_v7 }
  0x41   : > { %349 = vmatpush.bf16.msra.mxu0 %v630_v8 }
  0x42   : > { %432 = vmatpush.bf16.msra.mxu1 %v638_v9 }
  0x45   : > { %350 = vmatpush.bf16.msra.mxu0 %v629_v10 }
  0x46   : > { %433 = vmatpush.bf16.msra.mxu1 %v637_v11 }
  0x49   : > { %351 = vmatpush.bf16.msra.mxu0 %v628_v12 }
  0x4a   : > { %434 = vmatpush.bf16.msra.mxu1 %v636_v16 }
  0x4d   : > { %352 = vmatpush.bf16.msra.mxu0 %v627_v13 }
  0x4e   : > { %435 = vmatpush.bf16.msra.mxu1 %v635_v17 }
  0x50   : > { %353 = vmatmul.bf16.vlgmr.msra.gmra.mxu0 %v276_v15 }
  0xcd   : > { %v354_v19 = vpop.f32.mrf.mxu0 }
  0xce   : > { %v355_v20 = vadd.f32 %v712_v18, %v354_v19 }
  0xd0   : > { %v358_v21 = vmax.f32 %v355_v20, 0.0 }
  0xd2   : > { %v359_v22 = vpack.c.bf16 %v358_v21, %v358_v21 }
  0xd4   : > { %436 = vmatmul.bf16.vlgmr.msra.gmra.mxu1 %v359_v22 }
  0xd5   : > { %v356_v23 = vpop.f32.mrf.mxu0 }
 0x151   : > { %v437_v25 = vpop.f32.mrf.mxu1 }
 0x152   : > { %v438_v26 = vadd.f32 %v713_v24, %v437_v25 }
 0x154   : > { %441 = vst [vmem:[%s274_s28] sm:$0xff] %v438_v26 }
 0x155   : > { %831 = shalt.err (!%p828_p9)
}
 0x156   : > { %653 = dma.vmem_to_hbm [thread:$0]  (%p979_p4), %s456_s29, 128, %s458_s30, %s443_s16  }
 0x159   : > { %v439_v27 = vpop.f32.mrf.mxu1 }
 0x15a PF: > { %s469_s22 = sand.u32 1, %s862_s18   ;;  %p1080_p10 = scmp.ge.s32.totalorder %s874_s21, 2 }
 0x15b   : > { %s470_s9 = scalar_lea.sflag [#allocation4], %s469_s22 }
 0x15c   : > { %p667_p13 = pnand %p1080_p10, %p983_p6 }
 0x15e   : > { %p668_p11 = pneg %p667_p13 }
 0x160   : > { %857 = dma.done.wait (%p668_p11), %s470_s9, 128  }
 0x161   : > { %859 = vsyncadd (%p668_p11), %s470_s9, 4294967168  ;;  %p19_p0 = scmp.ge.s32.totalorder %s953_s12, 4   ;;  %s1081_s18 = smov %s866_s19 }
 0x162   : > { %s1082_s19 = smov %s870_s20  ;;  %s1083_s20 = smov %s964_s15 }
 0x163   : > { %s1084_s21 = smov %s953_s12  ;;  %21 = sbr.rel (!%p19_p0) target bundleno = 6 (0x6), region = 93 }
 0x168   :  { %476 = vsyncpa [#allocation3], 1 }
 0x169   :  { %478 = vsyncpa [#allocation3 + $0x1], 1 }
 0x16a   :  { %479 = vsyncpa [#allocation6], 1 }
 0x16b   :  { %480 = vsyncpa [#allocation4], 1 }
 0x16c   :  { %482 = vsyncpa [#allocation4 + $0x1], 1 }

// kernel: tpu_custom_call.1
= control target key start
LH: loop header
LB: loop body
LE: loop exit
PB: predicated region body
PF: predicated region fallthrough
CT: control target
= control target key end

     0   :  { %10 = vsyncpa [#allocation3], 0  ;;  %s1068_s0 = inlined_call_operand.hbm [shape: f32[16,128], index: 0, kind: input, shape index: {}]   ;;  %s1069_s1 = inlined_call_operand.hbm [shape: bf16[128,128], index: 1, kind: input, shape index: {}]   ;;  %s1070_s2 = inlined_call_operand.vmem [shape: f32[1,128], index: 2, kind: input, shape index: {}]   ;;  %s1071_s3 = inlined_call_operand.hbm [shape: bf16[128,128], index: 3, kind: input, shape index: {}]   ;;  %s1072_s4 = inlined_call_operand.vmem [shape: f32[1,128], index: 4, kind: input, shape index: {}]   ;;  %s1073_s5 = inlined_call_operand.hbm [shape: f32[16,128], index: 5, kind: output, shape index: {}]  }
   0x1   :  { %12 = vsyncpa [#allocation3 + $0x1], 0 }
   0x2   :  { %13 = vsyncpa [#allocation6], 0 }
   0x3   :  { %14 = vsyncpa [#allocation4], 0 }
   0x4   :  { %16 = vsyncpa [#allocation4 + $0x1], 0  ;;  %s910_s18 = smov 0   ;;  %s912_s19 = smov 0  }
   0x5   :  { %s914_s20 = smov 0   ;;  %s916_s21 = smov 0  }
   0x6 LB: > { %s174_s24 = sshll.u32 %s1069_s1, 4  ;;  %s934_s25 = sadd.s32 4294967295, %s874_s21   ;;  %s874_s21 = sphi %s916_s21, %s1084_s21   ;;  %s870_s20 = sphi %s914_s20, %s1083_s20   ;;  %s866_s19 = sphi %s912_s19, %s1082_s19   ;;  %s862_s18 = sphi %s910_s18, %s1081_s18   ;;  %s175_s24 = int_to_ptr.hbm [resolvable:$true] %s174_s24 }
   0x7   : > { %p548_p0 = scmp.ge.s32.totalorder %s874_s21, 1  ;;  %p43_p1 = scmp.eq.s32.totalorder %s934_s25, 0 }
   0x8   : > { %p163_p2 = scmp.lt.s32.totalorder %s874_s21, 3  ;;  %s876_s27 = smov [#allocation5]  }
   0x9   : > { %s176_s28 = sshll.u32 %s876_s27, 4  ;;  %s191_s6 = sshll.u32 %s1071_s3, 4  ;;  %s177_s28 = int_to_ptr.vmem [resolvable:$true] %s176_s28  ;;  %s192_s6 = int_to_ptr.hbm [resolvable:$true] %s191_s6 }
   0xa   : > { %p939_p3 = pnand %p548_p0, %p163_p2  ;;  %s877_s7 = smov [#allocation7]  }
   0xb   : > { %s193_s8 = sshll.u32 %s877_s7, 4  ;;  %s878_s9 = smov 64   ;;  %s194_s8 = int_to_ptr.vmem [resolvable:$true] %s193_s8 }
   0xc   : > { %p655_p4 = pneg %p939_p3  ;;  %s879_s10 = smov 4  }
   0xd   : > { %s547_s11 = sadd.s32 4294967294, %s874_s21   ;;  %s953_s12 = sadd.s32 1, %s874_s21  }
   0xe   : > { %p656_p6 = pnand %p655_p4, %p43_p1  ;;  %s26_s13 = ssub.s32 %s874_s21, %s953_s12 }
   0xf   : > { %s29_s14 = sadd.s32 1, %s870_s20  ;;  %p27_p7 = scmp.eq.s32.totalorder %s26_s13, 0 }
  0x10   : > { %658 = dma.hbm_to_vmem [thread:$0]  (!%p656_p6), %s175_s24, 1024, %s177_s28, [#allocation6], %s878_s9, %s878_s9, %s879_s10  }
  0x11   : > { %661 = dma.hbm_to_vmem [thread:$0]  (!%p656_p6), %s192_s6, 1024, %s194_s8, [#allocation6], %s878_s9, %s878_s9, %s879_s10  }
  0x12   : > { %p36_p8 = scmp.ne.s32.totalorder %s870_s20, %s866_s19  ;;  %p37_p9 = scmp.eq.s32.totalorder %s874_s21, 0 }
  0x13   : > { %p42_p10 = scmp.ne.s32.totalorder %s866_s19, %s862_s18  ;;  %p150_p13 = scmp.eq.s32.totalorder %s934_s25, 1 }
  0x14   : > { %s964_s15 = scalar_select %p27_p7, %s870_s20, %s29_s14  }
  0x15   : > { %p966_p11 = por %p37_p9, %p36_p8  ;;  %p972_p12 = por %p43_p1, %p42_p10 }
  0x16   : > { %p156_p0 = scmp.eq.s32.totalorder %s547_s11, 1  ;;  %p672_p2 = scmp.lt.s32.totalorder %s874_s21, 2 }
  0x17   : > { %s210_s22 = sand.u32 1, %s870_s20   ;;  %p979_p4 = por %p150_p13, %p36_p8 }
  0x18   : > { %p983_p6 = por %p156_p0, %p42_p10  ;;  %s552_s27 = sshll.u32 %s210_s22, 3 }
  0x19   : > { %s553_s28 = sshll.u32 %s874_s21, 3  ;;  %s214_s7 = scalar_lea.vmem [#allocation2], %s552_s27 }
  0x1a   : > { %s218_s6 = scalar_lea.hbm %s1068_s0, %s553_s28  ;;  %s222_s8 = sshll.u32 %s214_s7, 4  ;;  %s223_s8 = int_to_ptr.vmem [resolvable:$true] %s222_s8 }
  0x1b   : > { %s220_s9 = sshll.u32 %s218_s6, 4  ;;  %p993_p7 = pnand %p672_p2, %p966_p11  ;;  %s221_s9 = int_to_ptr.hbm [resolvable:$true] %s220_s9 }
  0x1c   : > { %s211_s11 = scalar_lea.sflag [#allocation3], %s210_s22  ;;  %s774_s13 = sshra.s32 %s221_s9, 4  ;;  %s775_s13 = int_to_ptr.hbm [resolvable:$true] %s774_s13 }
  0x1d   : > { %s776_s14 = scalar_lea.hbm %s775_s13, 8  ;;  %p778_p9 = pneg %p993_p7 }
  0x1e   : > { %p777_p8 = scmp.ne.s32.totalorder %s775_s13, %s776_s14  ;;  %s781_s29 = scalar_lea.hbm %s1068_s0, 16 }
  0x1f   : > { %p782_p11 = scmp.lt.s32.totalorder %s775_s13, %s1068_s0  ;;  %p783_p0 = scmp.lt.s32.totalorder %s781_s29, %s776_s14 }
  0x20   : > { %p779_p10 = pnand %p778_p9, %p777_p8 }
  0x21   : > { %p784_p2 = por %p783_p0, %p782_p11 }
  0x22   : > { %p780_p13 = pneg %p779_p10 }
  0x24   : > { %p785_p5 = pnand %p784_p2, %p780_p13 }
  0x26   : > { %788 = shalt.err (!%p785_p5)
}
  0x27   : > { %665 = dma.hbm_to_vmem [thread:$0]  (!%p993_p7), %s221_s9, 128, %s223_s8, %s211_s11  }
  0x28   : > { %231 = sbr.rel (%p939_p3) target bundleno = 346 (0x15a), region = 40  ;;  %s1010_s22 = sand.u32 (!%p939_p3), 1, %s866_s19  }
  0x29   : > { %s555_s6 = sshll.u32 (!%p939_p3), %s1010_s22, 3  ;;  %s234_s7 = scalar_lea.sflag (!%p939_p3), [#allocation3], %s1010_s22 }
  0x2a   : > { %s1016_s13 = scalar_lea.vmem (!%p939_p3), [#allocation2], %s555_s6 }
  0x2d   : > { %849 = dma.done.wait (%p972_p12), %s234_s7, 128  }
  0x2e   : > { %851 = vsyncadd (%p972_p12), %s234_s7, 4294967168 }
  0x2f   : > { %853 = dma.done.wait (%p43_p1), [#allocation6], 2048  }
  0x30   : > { %855 = vsyncadd (%p43_p1), [#allocation6], 4294965248  ;;  %v634_v0 = vld [vmem:[#allocation5 + $0x38] sm:$0xff]  ;;  %v633_v1 = vld [vmem:[#allocation5 + $0x30] sm:$0xff]  ;;  %s624_s8 = sshll.u32 %s934_s25, 3  ;;  %s274_s28 = scalar_lea.vmem [#allocation8], %s555_s6 }
  0x31   : > { %345 = vmatpush.bf16.msra.mxu0 %v634_v0  ;;  %v642_v2 = vld [vmem:[#allocation7 + $0x38] sm:$0xff]  ;;  %v641_v3 = vld [vmem:[#allocation7 + $0x30] sm:$0xff]  ;;  %v632_v4 = vld [vmem:[#allocation5 + $0x28] sm:$0xff]  ;;  %s453_s11 = scalar_lea.hbm %s1073_s5, %s624_s8  ;;  %s455_s29 = sshll.u32 %s274_s28, 4  ;;  %s456_s29 = int_to_ptr.vmem [resolvable:$true] %s455_s29 }
  0x32   : > { %428 = vmatpush.bf16.msra.mxu1 %v642_v2  ;;  %v640_v5 = vld [vmem:[#allocation7 + $0x28] sm:$0xff]  ;;  %v631_v6 = vld [vmem:[#allocation5 + $0x20] sm:$0xff]  ;;  %v630_v8 = vld [vmem:[#allocation5 + $0x18] sm:$0xff]  ;;  %s457_s30 = sshll.u32 %s453_s11, 4  ;;  %s443_s16 = scalar_lea.sflag [#allocation4], %s1010_s22  ;;  %s458_s30 = int_to_ptr.hbm [resolvable:$true] %s457_s30 }
  0x33   : > { %v639_v7 = vld [vmem:[#allocation7 + $0x20] sm:$0xff]  ;;  %v638_v9 = vld [vmem:[#allocation7 + $0x18] sm:$0xff]  ;;  %v629_v10 = vld [vmem:[#allocation5 + $0x10] sm:$0xff]  ;;  %s818_s25 = sshra.s32 %s458_s30, 4  ;;  %s824_s17 = scalar_lea.hbm %s1073_s5, 16  ;;  %s819_s25 = int_to_ptr.hbm [resolvable:$true] %s818_s25 }
  0x34   : > { %v637_v11 = vld [vmem:[#allocation7 + $0x10] sm:$0xff]  ;;  %v628_v12 = vld [vmem:[#allocation5 + $0x8] sm:$0xff]  ;;  %v627_v13 = vld [vmem:[#allocation5] sm:$0xff]  ;;  %s820_s7 = scalar_lea.hbm %s819_s25, 8  ;;  %p825_p12 = scmp.lt.s32.totalorder %s819_s25, %s1073_s5 }
  0x35   : > { %346 = vmatpush.bf16.msra.mxu0 %v633_v1  ;;  %v275_v14 = vld [vmem:[%s1016_s13] sm:$0xff]  ;;  %v636_v16 = vld [vmem:[#allocation7 + $0x8] sm:$0xff]  ;;  %v635_v17 = vld [vmem:[#allocation7] sm:$0xff]  ;;  %p821_p1 = scmp.ne.s32.totalorder %s819_s25, %s820_s7  ;;  %p826_p7 = scmp.lt.s32.totalorder %s824_s17, %s820_s7 }
  0x36   : > { %429 = vmatpush.bf16.msra.mxu1 %v641_v3  ;;  %v276_v15 = vpack.c.bf16 %v275_v14, %v275_v14  ;;  %v712_v18 = vld [vmem:[%s1070_s2] ss:$0 sm:$0xff] }
  0x37   : > { %v713_v24 = vld [vmem:[%s1072_s4] ss:$0 sm:$0xff]  ;;  %p822_p3 = pnand %p821_p1, %p979_p4  ;;  %p827_p8 = por %p826_p7, %p825_p12 }
  0x39   : > { %347 = vmatpush.bf16.msra.mxu0 %v632_v4  ;;  %p823_p5 = pneg %p822_p3 }
  0x3a   : > { %430 = vmatpush.bf16.msra.mxu1 %v640_v5 }
  0x3b   : > { %p828_p9 = pnand %p827_p8, %p823_p5 }
  0x3d   : > { %348 = vmatpush.bf16.msra.mxu0 %v631_v6 }
  0x3e   : > { %431 = vmatpush.bf16.msra.mxu1 %v639_v7 }
  0x41   : > { %349 = vmatpush.bf16.msra.mxu0 %v630_v8 }
  0x42   : > { %432 = vmatpush.bf16.msra.mxu1 %v638_v9 }
  0x45   : > { %350 = vmatpush.bf16.msra.mxu0 %v629_v10 }
  0x46   : > { %433 = vmatpush.bf16.msra.mxu1 %v637_v11 }
  0x49   : > { %351 = vmatpush.bf16.msra.mxu0 %v628_v12 }
  0x4a   : > { %434 = vmatpush.bf16.msra.mxu1 %v636_v16 }
  0x4d   : > { %352 = vmatpush.bf16.msra.mxu0 %v627_v13 }
  0x4e   : > { %435 = vmatpush.bf16.msra.mxu1 %v635_v17 }
  0x50   : > { %353 = vmatmul.bf16.vlgmr.msra.gmra.mxu0 %v276_v15 }
  0xcd   : > { %v354_v19 = vpop.f32.mrf.mxu0 }
  0xce   : > { %v355_v20 = vadd.f32 %v712_v18, %v354_v19 }
  0xd0   : > { %v358_v21 = vmax.f32 %v355_v20, 0.0 }
  0xd2   : > { %v359_v22 = vpack.c.bf16 %v358_v21, %v358_v21 }
  0xd4   : > { %436 = vmatmul.bf16.vlgmr.msra.gmra.mxu1 %v359_v22 }
  0xd5   : > { %v356_v23 = vpop.f32.mrf.mxu0 }
 0x151   : > { %v437_v25 = vpop.f32.mrf.mxu1 }
 0x152   : > { %v438_v26 = vadd.f32 %v713_v24, %v437_v25 }
 0x154   : > { %441 = vst [vmem:[%s274_s28] sm:$0xff] %v438_v26 }
 0x155   : > { %831 = shalt.err (!%p828_p9)
}
 0x156   : > { %653 = dma.vmem_to_hbm [thread:$0]  (%p979_p4), %s456_s29, 128, %s458_s30, %s443_s16  }
 0x159   : > { %v439_v27 = vpop.f32.mrf.mxu1 }
 0x15a PF: > { %s469_s22 = sand.u32 1, %s862_s18   ;;  %p1080_p10 = scmp.ge.s32.totalorder %s874_s21, 2 }
 0x15b   : > { %s470_s9 = scalar_lea.sflag [#allocation4], %s469_s22 }
 0x15c   : > { %p667_p13 = pnand %p1080_p10, %p983_p6 }
 0x15e   : > { %p668_p11 = pneg %p667_p13 }
 0x160   : > { %857 = dma.done.wait (%p668_p11), %s470_s9, 128  }
 0x161   : > { %859 = vsyncadd (%p668_p11), %s470_s9, 4294967168  ;;  %p19_p0 = scmp.ge.s32.totalorder %s953_s12, 4   ;;  %s1081_s18 = smov %s866_s19 }
 0x162   : > { %s1082_s19 = smov %s870_s20  ;;  %s1083_s20 = smov %s964_s15 }
 0x163   : > { %s1084_s21 = smov %s953_s12  ;;  %21 = sbr.rel (!%p19_p0) target bundleno = 6 (0x6), region = 93 }
 0x168   :  { %476 = vsyncpa [#allocation3], 1 }
 0x169   :  { %478 = vsyncpa [#allocation3 + $0x1], 1 }
 0x16a   :  { %479 = vsyncpa [#allocation6], 1 }
 0x16b   :  { %480 = vsyncpa [#allocation4], 1 }
 0x16c   :  { %482 = vsyncpa [#allocation4 + $0x1], 1 }

</bundles_post_ra>
